<compile_context>
chip_gen: v7x
topology: tpu7x:2x2x1
jax: 0.10.0
libtpu: 0.0.40
codegen_flags: <defaults>
</compile_context>

<pallas_src>
import jax
import jax.numpy as jnp
import numpy as np
from jax import lax
from jax.experimental import pallas as pl
from jax.experimental.pallas import tpu as pltpu

LANES = 128            # particles per lane row
MAX_BLOCK_ROWS = 512   # rows per grid step -> 512*128 = 65536 particles/step (sweepable)


def nn_basis_kernel(p_ref, x_ref, o_ref):
    """p_ref: SMEM (3*H1+1,) = [w_eff | b_eff | w3 | b3]; x_ref/o_ref: (BLOCK_ROWS, 128)."""
    h1 = (p_ref.shape[0] - 1) // 3
    block_rows = x_ref.shape[0]
    # Largest sublane-aligned chunk that divides the block (block_rows is a multiple of 8).
    chunk = 32 if block_rows % 32 == 0 else (16 if block_rows % 16 == 0 else 8)

    # Hoist all scalar SMEM reads out of the chunk loop (loop-invariant sregs).
    w = [p_ref[k] for k in range(h1)]
    b = [p_ref[h1 + k] for k in range(h1)]
    w3 = [p_ref[2 * h1 + k] for k in range(h1)]
    b3 = p_ref[3 * h1]

    def one_chunk(r):
        xr = x_ref[pl.ds(r, chunk), :]                              # (chunk, 128)
        acc = w3[0] * jnp.maximum(w[0] * xr + b[0], 0.0)
        for k in range(1, h1):                                      # unrolled over hidden units
            acc = acc + w3[k] * jnp.maximum(w[k] * xr + b[k], 0.0)
        o_ref[pl.ds(r, chunk), :] = acc + b3                        # unmasked dense store

    trips = block_rows // chunk
    if trips == 1:
        one_chunk(0)
    else:
        def body(c, carry):
            one_chunk(pl.multiple_of(c * chunk, chunk))
            return carry
        lax.fori_loop(0, trips, body, 0)


def pack_params(params, xmin, xmax):
    """Fold normalization + Linear(1,H0) + Linear(H0,H1) and pack into one flat slab.

    Raw params (stored transposed vs. PyTorch, i.e. (in, out)):
      w1 (1,H0), b1 (1,H0), w2 (H0,H1), b2 (1,H1), w3 (H1,1), b3 (1,1)

    There is no nonlinearity between the first two linears, so exactly:
      h2 = ((x - xmin)/(xmax - xmin)) * w1 @ w2 + b1 @ w2 + b2 = x * w_eff + b_eff
    Returns a flat f32 array [w_eff(H1) | b_eff(H1) | w3(H1) | b3] for SMEM.
    """
    # TODO(synk): only the 2-hidden-layer config ([H0, H1]) is folded here; deeper
    # hidden_layer_sizes (extra ReLU+Linear pairs) would need per-layer matmuls.
    w1, b1, w2, b2, w3, b3 = params
    inv_range = 1.0 / (xmax - xmin)
    w12 = w1 @ w2                                        # (1, H1)
    w_eff = inv_range * w12                              # (1, H1)
    b_eff = b1 @ w2 + b2 - (xmin * inv_range) * w12      # (1, H1)
    flat = jnp.concatenate([
        w_eff[0], b_eff[0], w3[:, 0],
        jnp.array([b3[0, 0]], jnp.float32),
    ]).astype(jnp.float32)                               # (3*H1 + 1,)
    return flat


def nn_basis_1d(positions, packed, axis="x"):
    """positions: (N, 3) f32 (N=1 reproduces the PyTorch module exactly).

    Returns potential per particle, shape (N,).
    """
    if axis == "x":
        col = 0
    elif axis == "y":
        col = 1
    else:
        raise ValueError("Invalid axis")

    n = positions.shape[0]
    xcol = positions[:, col].astype(jnp.float32)

    # Sublane+lane dense layout: particles fill (rows, 128); rows padded to a
    # multiple of 8 (small N) or of MAX_BLOCK_ROWS (large N).
    rows = pl.cdiv(n, LANES)
    rows8 = max(8, ((rows + 7) // 8) * 8)
    if rows8 >= MAX_BLOCK_ROWS:
        block_rows = MAX_BLOCK_ROWS
        rows_pad = pl.cdiv(rows8, block_rows) * block_rows
    else:
        block_rows = rows8
        rows_pad = rows8
    n_pad = rows_pad * LANES

    x2d = jnp.pad(xcol, (0, n_pad - n)).reshape(rows_pad, LANES)

    out = pl.pallas_call(
        nn_basis_kernel,
        out_shape=jax.ShapeDtypeStruct((rows_pad, LANES), jnp.float32),
        grid=(rows_pad // block_rows,),
        in_specs=[
            pl.BlockSpec(memory_space=pltpu.MemorySpace.SMEM),      # packed params
            pl.BlockSpec((block_rows, LANES), lambda i: (i, 0)),    # particle tile
        ],
        out_specs=pl.BlockSpec((block_rows, LANES), lambda i: (i, 0)),
        compiler_params=pltpu.CompilerParams(
            dimension_semantics=("parallel",)),
    )(packed, x2d)
    return out.reshape(-1)[:n]


def init_params(key, hidden_layer_sizes):
    """Init mimicking torch.nn.Linear default (uniform +-1/sqrt(fan_in)).

    Weights stored as (in_features, out_features); biases as (1, out_features).
    """
    sizes = [1] + list(hidden_layer_sizes) + [1]
    params = []
    for i in range(len(sizes) - 1):
        fan_in, fan_out = sizes[i], sizes[i + 1]
        bound = 1.0 / np.sqrt(fan_in)
        key, kw, kb = jax.random.split(key, 3)
        w = jax.random.uniform(kw, (fan_in, fan_out), jnp.float32, -bound, bound)
        b = jax.random.uniform(kb, (1, fan_out), jnp.float32, -bound, bound)
        params += [w, b]
    return tuple(params)


def nn_basis_1d_ref(positions, params, xmin, xmax, axis="x"):
    """Pure-JAX layer-by-layer reference of the PyTorch forward."""
    w1, b1, w2, b2, w3, b3 = params
    col = 0 if axis == "x" else 1
    x = (positions[:, col:col + 1] - xmin) / (xmax - xmin)   # (N, 1)
    h = x @ w1 + b1                                          # Linear(1, H0)
    h = h @ w2 + b2                                          # Linear(H0, H1)
    h = jnp.maximum(h, 0.0)                                  # ReLU
    y = h @ w3 + b3                                          # Linear(H1, 1)
    return y[:, 0]


if __name__ == "__main__":
    key = jax.random.PRNGKey(0)
    k_pos, k_par, k_b1, k_b2 = jax.random.split(key, 4)

    # Module config: min=0.0, max=2.0, axis='x', hidden_layer_sizes=[32, 32]
    XMIN, XMAX, AXIS = 0.0, 2.0, "x"
    hidden_layer_sizes = [32, 32]

    params = init_params(k_par, hidden_layer_sizes)
    packed = pack_params(params, XMIN, XMAX)

    # Exact PyTorch-module shape: one particle, positions (1, 3) -> (1,)
    positions = jax.random.uniform(k_pos, (1, 3), jnp.float32, 0.0, 2.0)
    out = nn_basis_1d(positions, packed, AXIS)
    jax.block_until_ready(out)
    expected = nn_basis_1d_ref(positions, params, XMIN, XMAX, AXIS)
    np.testing.assert_allclose(np.asarray(out), np.asarray(expected),
                               rtol=1e-5, atol=1e-5)

    # Batched paths (amortize launch/DMA; exercise lane padding + multi-row tiles).
    for kk, nb in ((k_b1, 5), (k_b2, 300)):
        pos_b = jax.random.uniform(kk, (nb, 3), jnp.float32, 0.0, 2.0)
        out_b = nn_basis_1d(pos_b, packed, AXIS)
        jax.block_until_ready(out_b)
        exp_b = nn_basis_1d_ref(pos_b, params, XMIN, XMAX, AXIS)
        np.testing.assert_allclose(np.asarray(out_b), np.asarray(exp_b),
                                   rtol=1e-5, atol=1e-5)

    print("KERNEL_OK")
</pallas_src>

<mosaic_0001>
module attributes {stable_mosaic.version = 11 : i64} {
  func.func @nn_basis_kernel(%arg0: i32, %arg1: memref<97xf32, #tpu.memory_space<smem>>, %arg2: memref<8x128xf32, #tpu.memory_space<vmem>>, %arg3: memref<8x128xf32, #tpu.memory_space<vmem>>) attributes {dimension_semantics = [#tpu.dimension_semantics<parallel>], iteration_bounds = array<i64: 1>, scalar_prefetch = 0 : i64, scratch_operands = 0 : i64, tpu.core_type = #tpu.core_type<tc>, window_params = [{transform_indices = @transform_0, window_bounds = array<i64: 97>}, {transform_indices = @transform_1, window_bounds = array<i64: 8, 128>}, {transform_indices = @transform_2, window_bounds = array<i64: 8, 128>}]} {
    %c0 = arith.constant 0 : index
    %0 = memref.load %arg1[%c0] : memref<97xf32, #tpu.memory_space<smem>>
    %c1 = arith.constant 1 : index
    %1 = memref.load %arg1[%c1] : memref<97xf32, #tpu.memory_space<smem>>
    %c2 = arith.constant 2 : index
    %2 = memref.load %arg1[%c2] : memref<97xf32, #tpu.memory_space<smem>>
    %c3 = arith.constant 3 : index
    %3 = memref.load %arg1[%c3] : memref<97xf32, #tpu.memory_space<smem>>
    %c4 = arith.constant 4 : index
    %4 = memref.load %arg1[%c4] : memref<97xf32, #tpu.memory_space<smem>>
    %c5 = arith.constant 5 : index
    %5 = memref.load %arg1[%c5] : memref<97xf32, #tpu.memory_space<smem>>
    %c6 = arith.constant 6 : index
    %6 = memref.load %arg1[%c6] : memref<97xf32, #tpu.memory_space<smem>>
    %c7 = arith.constant 7 : index
    %7 = memref.load %arg1[%c7] : memref<97xf32, #tpu.memory_space<smem>>
    %c8 = arith.constant 8 : index
    %8 = memref.load %arg1[%c8] : memref<97xf32, #tpu.memory_space<smem>>
    %c9 = arith.constant 9 : index
    %9 = memref.load %arg1[%c9] : memref<97xf32, #tpu.memory_space<smem>>
    %c10 = arith.constant 10 : index
    %10 = memref.load %arg1[%c10] : memref<97xf32, #tpu.memory_space<smem>>
    %c11 = arith.constant 11 : index
    %11 = memref.load %arg1[%c11] : memref<97xf32, #tpu.memory_space<smem>>
    %c12 = arith.constant 12 : index
    %12 = memref.load %arg1[%c12] : memref<97xf32, #tpu.memory_space<smem>>
    %c13 = arith.constant 13 : index
    %13 = memref.load %arg1[%c13] : memref<97xf32, #tpu.memory_space<smem>>
    %c14 = arith.constant 14 : index
    %14 = memref.load %arg1[%c14] : memref<97xf32, #tpu.memory_space<smem>>
    %c15 = arith.constant 15 : index
    %15 = memref.load %arg1[%c15] : memref<97xf32, #tpu.memory_space<smem>>
    %c16 = arith.constant 16 : index
    %16 = memref.load %arg1[%c16] : memref<97xf32, #tpu.memory_space<smem>>
    %c17 = arith.constant 17 : index
    %17 = memref.load %arg1[%c17] : memref<97xf32, #tpu.memory_space<smem>>
    %c18 = arith.constant 18 : index
    %18 = memref.load %arg1[%c18] : memref<97xf32, #tpu.memory_space<smem>>
    %c19 = arith.constant 19 : index
    %19 = memref.load %arg1[%c19] : memref<97xf32, #tpu.memory_space<smem>>
    %c20 = arith.constant 20 : index
    %20 = memref.load %arg1[%c20] : memref<97xf32, #tpu.memory_space<smem>>
    %c21 = arith.constant 21 : index
    %21 = memref.load %arg1[%c21] : memref<97xf32, #tpu.memory_space<smem>>
    %c22 = arith.constant 22 : index
    %22 = memref.load %arg1[%c22] : memref<97xf32, #tpu.memory_space<smem>>
    %c23 = arith.constant 23 : index
    %23 = memref.load %arg1[%c23] : memref<97xf32, #tpu.memory_space<smem>>
    %c24 = arith.constant 24 : index
    %24 = memref.load %arg1[%c24] : memref<97xf32, #tpu.memory_space<smem>>
    %c25 = arith.constant 25 : index
    %25 = memref.load %arg1[%c25] : memref<97xf32, #tpu.memory_space<smem>>
    %c26 = arith.constant 26 : index
    %26 = memref.load %arg1[%c26] : memref<97xf32, #tpu.memory_space<smem>>
    %c27 = arith.constant 27 : index
    %27 = memref.load %arg1[%c27] : memref<97xf32, #tpu.memory_space<smem>>
    %c28 = arith.constant 28 : index
    %28 = memref.load %arg1[%c28] : memref<97xf32, #tpu.memory_space<smem>>
    %c29 = arith.constant 29 : index
    %29 = memref.load %arg1[%c29] : memref<97xf32, #tpu.memory_space<smem>>
    %c30 = arith.constant 30 : index
    %30 = memref.load %arg1[%c30] : memref<97xf32, #tpu.memory_space<smem>>
    %c31 = arith.constant 31 : index
    %31 = memref.load %arg1[%c31] : memref<97xf32, #tpu.memory_space<smem>>
    %c32 = arith.constant 32 : index
    %32 = memref.load %arg1[%c32] : memref<97xf32, #tpu.memory_space<smem>>
    %c33 = arith.constant 33 : index
    %33 = memref.load %arg1[%c33] : memref<97xf32, #tpu.memory_space<smem>>
    %c34 = arith.constant 34 : index
    %34 = memref.load %arg1[%c34] : memref<97xf32, #tpu.memory_space<smem>>
    %c35 = arith.constant 35 : index
    %35 = memref.load %arg1[%c35] : memref<97xf32, #tpu.memory_space<smem>>
    %c36 = arith.constant 36 : index
    %36 = memref.load %arg1[%c36] : memref<97xf32, #tpu.memory_space<smem>>
    %c37 = arith.constant 37 : index
    %37 = memref.load %arg1[%c37] : memref<97xf32, #tpu.memory_space<smem>>
    %c38 = arith.constant 38 : index
    %38 = memref.load %arg1[%c38] : memref<97xf32, #tpu.memory_space<smem>>
    %c39 = arith.constant 39 : index
    %39 = memref.load %arg1[%c39] : memref<97xf32, #tpu.memory_space<smem>>
    %c40 = arith.constant 40 : index
    %40 = memref.load %arg1[%c40] : memref<97xf32, #tpu.memory_space<smem>>
    %c41 = arith.constant 41 : index
    %41 = memref.load %arg1[%c41] : memref<97xf32, #tpu.memory_space<smem>>
    %c42 = arith.constant 42 : index
    %42 = memref.load %arg1[%c42] : memref<97xf32, #tpu.memory_space<smem>>
    %c43 = arith.constant 43 : index
    %43 = memref.load %arg1[%c43] : memref<97xf32, #tpu.memory_space<smem>>
    %c44 = arith.constant 44 : index
    %44 = memref.load %arg1[%c44] : memref<97xf32, #tpu.memory_space<smem>>
    %c45 = arith.constant 45 : index
    %45 = memref.load %arg1[%c45] : memref<97xf32, #tpu.memory_space<smem>>
    %c46 = arith.constant 46 : index
    %46 = memref.load %arg1[%c46] : memref<97xf32, #tpu.memory_space<smem>>
    %c47 = arith.constant 47 : index
    %47 = memref.load %arg1[%c47] : memref<97xf32, #tpu.memory_space<smem>>
    %c48 = arith.constant 48 : index
    %48 = memref.load %arg1[%c48] : memref<97xf32, #tpu.memory_space<smem>>
    %c49 = arith.constant 49 : index
    %49 = memref.load %arg1[%c49] : memref<97xf32, #tpu.memory_space<smem>>
    %c50 = arith.constant 50 : index
    %50 = memref.load %arg1[%c50] : memref<97xf32, #tpu.memory_space<smem>>
    %c51 = arith.constant 51 : index
    %51 = memref.load %arg1[%c51] : memref<97xf32, #tpu.memory_space<smem>>
    %c52 = arith.constant 52 : index
    %52 = memref.load %arg1[%c52] : memref<97xf32, #tpu.memory_space<smem>>
    %c53 = arith.constant 53 : index
    %53 = memref.load %arg1[%c53] : memref<97xf32, #tpu.memory_space<smem>>
    %c54 = arith.constant 54 : index
    %54 = memref.load %arg1[%c54] : memref<97xf32, #tpu.memory_space<smem>>
    %c55 = arith.constant 55 : index
    %55 = memref.load %arg1[%c55] : memref<97xf32, #tpu.memory_space<smem>>
    %c56 = arith.constant 56 : index
    %56 = memref.load %arg1[%c56] : memref<97xf32, #tpu.memory_space<smem>>
    %c57 = arith.constant 57 : index
    %57 = memref.load %arg1[%c57] : memref<97xf32, #tpu.memory_space<smem>>
    %c58 = arith.constant 58 : index
    %58 = memref.load %arg1[%c58] : memref<97xf32, #tpu.memory_space<smem>>
    %c59 = arith.constant 59 : index
    %59 = memref.load %arg1[%c59] : memref<97xf32, #tpu.memory_space<smem>>
    %c60 = arith.constant 60 : index
    %60 = memref.load %arg1[%c60] : memref<97xf32, #tpu.memory_space<smem>>
    %c61 = arith.constant 61 : index
    %61 = memref.load %arg1[%c61] : memref<97xf32, #tpu.memory_space<smem>>
    %c62 = arith.constant 62 : index
    %62 = memref.load %arg1[%c62] : memref<97xf32, #tpu.memory_space<smem>>
    %c63 = arith.constant 63 : index
    %63 = memref.load %arg1[%c63] : memref<97xf32, #tpu.memory_space<smem>>
    %c64 = arith.constant 64 : index
    %64 = memref.load %arg1[%c64] : memref<97xf32, #tpu.memory_space<smem>>
    %c65 = arith.constant 65 : index
    %65 = memref.load %arg1[%c65] : memref<97xf32, #tpu.memory_space<smem>>
    %c66 = arith.constant 66 : index
    %66 = memref.load %arg1[%c66] : memref<97xf32, #tpu.memory_space<smem>>
    %c67 = arith.constant 67 : index
    %67 = memref.load %arg1[%c67] : memref<97xf32, #tpu.memory_space<smem>>
    %c68 = arith.constant 68 : index
    %68 = memref.load %arg1[%c68] : memref<97xf32, #tpu.memory_space<smem>>
    %c69 = arith.constant 69 : index
    %69 = memref.load %arg1[%c69] : memref<97xf32, #tpu.memory_space<smem>>
    %c70 = arith.constant 70 : index
    %70 = memref.load %arg1[%c70] : memref<97xf32, #tpu.memory_space<smem>>
    %c71 = arith.constant 71 : index
    %71 = memref.load %arg1[%c71] : memref<97xf32, #tpu.memory_space<smem>>
    %c72 = arith.constant 72 : index
    %72 = memref.load %arg1[%c72] : memref<97xf32, #tpu.memory_space<smem>>
    %c73 = arith.constant 73 : index
    %73 = memref.load %arg1[%c73] : memref<97xf32, #tpu.memory_space<smem>>
    %c74 = arith.constant 74 : index
    %74 = memref.load %arg1[%c74] : memref<97xf32, #tpu.memory_space<smem>>
    %c75 = arith.constant 75 : index
    %75 = memref.load %arg1[%c75] : memref<97xf32, #tpu.memory_space<smem>>
    %c76 = arith.constant 76 : index
    %76 = memref.load %arg1[%c76] : memref<97xf32, #tpu.memory_space<smem>>
    %c77 = arith.constant 77 : index
    %77 = memref.load %arg1[%c77] : memref<97xf32, #tpu.memory_space<smem>>
    %c78 = arith.constant 78 : index
    %78 = memref.load %arg1[%c78] : memref<97xf32, #tpu.memory_space<smem>>
    %c79 = arith.constant 79 : index
    %79 = memref.load %arg1[%c79] : memref<97xf32, #tpu.memory_space<smem>>
    %c80 = arith.constant 80 : index
    %80 = memref.load %arg1[%c80] : memref<97xf32, #tpu.memory_space<smem>>
    %c81 = arith.constant 81 : index
    %81 = memref.load %arg1[%c81] : memref<97xf32, #tpu.memory_space<smem>>
    %c82 = arith.constant 82 : index
    %82 = memref.load %arg1[%c82] : memref<97xf32, #tpu.memory_space<smem>>
    %c83 = arith.constant 83 : index
    %83 = memref.load %arg1[%c83] : memref<97xf32, #tpu.memory_space<smem>>
    %c84 = arith.constant 84 : index
    %84 = memref.load %arg1[%c84] : memref<97xf32, #tpu.memory_space<smem>>
    %c85 = arith.constant 85 : index
    %85 = memref.load %arg1[%c85] : memref<97xf32, #tpu.memory_space<smem>>
    %c86 = arith.constant 86 : index
    %86 = memref.load %arg1[%c86] : memref<97xf32, #tpu.memory_space<smem>>
    %c87 = arith.constant 87 : index
    %87 = memref.load %arg1[%c87] : memref<97xf32, #tpu.memory_space<smem>>
    %c88 = arith.constant 88 : index
    %88 = memref.load %arg1[%c88] : memref<97xf32, #tpu.memory_space<smem>>
    %c89 = arith.constant 89 : index
    %89 = memref.load %arg1[%c89] : memref<97xf32, #tpu.memory_space<smem>>
    %c90 = arith.constant 90 : index
    %90 = memref.load %arg1[%c90] : memref<97xf32, #tpu.memory_space<smem>>
    %c91 = arith.constant 91 : index
    %91 = memref.load %arg1[%c91] : memref<97xf32, #tpu.memory_space<smem>>
    %c92 = arith.constant 92 : index
    %92 = memref.load %arg1[%c92] : memref<97xf32, #tpu.memory_space<smem>>
    %c93 = arith.constant 93 : index
    %93 = memref.load %arg1[%c93] : memref<97xf32, #tpu.memory_space<smem>>
    %c94 = arith.constant 94 : index
    %94 = memref.load %arg1[%c94] : memref<97xf32, #tpu.memory_space<smem>>
    %c95 = arith.constant 95 : index
    %95 = memref.load %arg1[%c95] : memref<97xf32, #tpu.memory_space<smem>>
    %c96 = arith.constant 96 : index
    %96 = memref.load %arg1[%c96] : memref<97xf32, #tpu.memory_space<smem>>
    %c0_0 = arith.constant 0 : index
    %c0_1 = arith.constant 0 : index
    %97 = vector.load %arg2[%c0_0, %c0_1] : memref<8x128xf32, #tpu.memory_space<vmem>>, vector<8x128xf32>
    %98 = vector.broadcast %0 : f32 to vector<8x128xf32>
    %99 = arith.mulf %98, %97 : vector<8x128xf32>
    %100 = vector.broadcast %32 : f32 to vector<8x128xf32>
    %101 = arith.addf %99, %100 : vector<8x128xf32>
    %cst = arith.constant 0.000000e+00 : f32
    %102 = vector.broadcast %cst : f32 to vector<8x128xf32>
    %103 = arith.maximumf %101, %102 : vector<8x128xf32>
    %104 = vector.broadcast %64 : f32 to vector<8x128xf32>
    %105 = arith.mulf %104, %103 : vector<8x128xf32>
    %106 = vector.broadcast %1 : f32 to vector<8x128xf32>
    %107 = arith.mulf %106, %97 : vector<8x128xf32>
    %108 = vector.broadcast %33 : f32 to vector<8x128xf32>
    %109 = arith.addf %107, %108 : vector<8x128xf32>
    %cst_2 = arith.constant 0.000000e+00 : f32
    %110 = vector.broadcast %cst_2 : f32 to vector<8x128xf32>
    %111 = arith.maximumf %109, %110 : vector<8x128xf32>
    %112 = vector.broadcast %65 : f32 to vector<8x128xf32>
    %113 = arith.mulf %112, %111 : vector<8x128xf32>
    %114 = arith.addf %105, %113 : vector<8x128xf32>
    %115 = vector.broadcast %2 : f32 to vector<8x128xf32>
    %116 = arith.mulf %115, %97 : vector<8x128xf32>
    %117 = vector.broadcast %34 : f32 to vector<8x128xf32>
    %118 = arith.addf %116, %117 : vector<8x128xf32>
    %cst_3 = arith.constant 0.000000e+00 : f32
    %119 = vector.broadcast %cst_3 : f32 to vector<8x128xf32>
    %120 = arith.maximumf %118, %119 : vector<8x128xf32>
    %121 = vector.broadcast %66 : f32 to vector<8x128xf32>
    %122 = arith.mulf %121, %120 : vector<8x128xf32>
    %123 = arith.addf %114, %122 : vector<8x128xf32>
    %124 = vector.broadcast %3 : f32 to vector<8x128xf32>
    %125 = arith.mulf %124, %97 : vector<8x128xf32>
    %126 = vector.broadcast %35 : f32 to vector<8x128xf32>
    %127 = arith.addf %125, %126 : vector<8x128xf32>
    %cst_4 = arith.constant 0.000000e+00 : f32
    %128 = vector.broadcast %cst_4 : f32 to vector<8x128xf32>
    %129 = arith.maximumf %127, %128 : vector<8x128xf32>
    %130 = vector.broadcast %67 : f32 to vector<8x128xf32>
    %131 = arith.mulf %130, %129 : vector<8x128xf32>
    %132 = arith.addf %123, %131 : vector<8x128xf32>
    %133 = vector.broadcast %4 : f32 to vector<8x128xf32>
    %134 = arith.mulf %133, %97 : vector<8x128xf32>
    %135 = vector.broadcast %36 : f32 to vector<8x128xf32>
    %136 = arith.addf %134, %135 : vector<8x128xf32>
    %cst_5 = arith.constant 0.000000e+00 : f32
    %137 = vector.broadcast %cst_5 : f32 to vector<8x128xf32>
    %138 = arith.maximumf %136, %137 : vector<8x128xf32>
    %139 = vector.broadcast %68 : f32 to vector<8x128xf32>
    %140 = arith.mulf %139, %138 : vector<8x128xf32>
    %141 = arith.addf %132, %140 : vector<8x128xf32>
    %142 = vector.broadcast %5 : f32 to vector<8x128xf32>
    %143 = arith.mulf %142, %97 : vector<8x128xf32>
    %144 = vector.broadcast %37 : f32 to vector<8x128xf32>
    %145 = arith.addf %143, %144 : vector<8x128xf32>
    %cst_6 = arith.constant 0.000000e+00 : f32
    %146 = vector.broadcast %cst_6 : f32 to vector<8x128xf32>
    %147 = arith.maximumf %145, %146 : vector<8x128xf32>
    %148 = vector.broadcast %69 : f32 to vector<8x128xf32>
    %149 = arith.mulf %148, %147 : vector<8x128xf32>
    %150 = arith.addf %141, %149 : vector<8x128xf32>
    %151 = vector.broadcast %6 : f32 to vector<8x128xf32>
    %152 = arith.mulf %151, %97 : vector<8x128xf32>
    %153 = vector.broadcast %38 : f32 to vector<8x128xf32>
    %154 = arith.addf %152, %153 : vector<8x128xf32>
    %cst_7 = arith.constant 0.000000e+00 : f32
    %155 = vector.broadcast %cst_7 : f32 to vector<8x128xf32>
    %156 = arith.maximumf %154, %155 : vector<8x128xf32>
    %157 = vector.broadcast %70 : f32 to vector<8x128xf32>
    %158 = arith.mulf %157, %156 : vector<8x128xf32>
    %159 = arith.addf %150, %158 : vector<8x128xf32>
    %160 = vector.broadcast %7 : f32 to vector<8x128xf32>
    %161 = arith.mulf %160, %97 : vector<8x128xf32>
    %162 = vector.broadcast %39 : f32 to vector<8x128xf32>
    %163 = arith.addf %161, %162 : vector<8x128xf32>
    %cst_8 = arith.constant 0.000000e+00 : f32
    %164 = vector.broadcast %cst_8 : f32 to vector<8x128xf32>
    %165 = arith.maximumf %163, %164 : vector<8x128xf32>
    %166 = vector.broadcast %71 : f32 to vector<8x128xf32>
    %167 = arith.mulf %166, %165 : vector<8x128xf32>
    %168 = arith.addf %159, %167 : vector<8x128xf32>
    %169 = vector.broadcast %8 : f32 to vector<8x128xf32>
    %170 = arith.mulf %169, %97 : vector<8x128xf32>
    %171 = vector.broadcast %40 : f32 to vector<8x128xf32>
    %172 = arith.addf %170, %171 : vector<8x128xf32>
    %cst_9 = arith.constant 0.000000e+00 : f32
    %173 = vector.broadcast %cst_9 : f32 to vector<8x128xf32>
    %174 = arith.maximumf %172, %173 : vector<8x128xf32>
    %175 = vector.broadcast %72 : f32 to vector<8x128xf32>
    %176 = arith.mulf %175, %174 : vector<8x128xf32>
    %177 = arith.addf %168, %176 : vector<8x128xf32>
    %178 = vector.broadcast %9 : f32 to vector<8x128xf32>
    %179 = arith.mulf %178, %97 : vector<8x128xf32>
    %180 = vector.broadcast %41 : f32 to vector<8x128xf32>
    %181 = arith.addf %179, %180 : vector<8x128xf32>
    %cst_10 = arith.constant 0.000000e+00 : f32
    %182 = vector.broadcast %cst_10 : f32 to vector<8x128xf32>
    %183 = arith.maximumf %181, %182 : vector<8x128xf32>
    %184 = vector.broadcast %73 : f32 to vector<8x128xf32>
    %185 = arith.mulf %184, %183 : vector<8x128xf32>
    %186 = arith.addf %177, %185 : vector<8x128xf32>
    %187 = vector.broadcast %10 : f32 to vector<8x128xf32>
    %188 = arith.mulf %187, %97 : vector<8x128xf32>
    %189 = vector.broadcast %42 : f32 to vector<8x128xf32>
    %190 = arith.addf %188, %189 : vector<8x128xf32>
    %cst_11 = arith.constant 0.000000e+00 : f32
    %191 = vector.broadcast %cst_11 : f32 to vector<8x128xf32>
    %192 = arith.maximumf %190, %191 : vector<8x128xf32>
    %193 = vector.broadcast %74 : f32 to vector<8x128xf32>
    %194 = arith.mulf %193, %192 : vector<8x128xf32>
    %195 = arith.addf %186, %194 : vector<8x128xf32>
    %196 = vector.broadcast %11 : f32 to vector<8x128xf32>
    %197 = arith.mulf %196, %97 : vector<8x128xf32>
    %198 = vector.broadcast %43 : f32 to vector<8x128xf32>
    %199 = arith.addf %197, %198 : vector<8x128xf32>
    %cst_12 = arith.constant 0.000000e+00 : f32
    %200 = vector.broadcast %cst_12 : f32 to vector<8x128xf32>
    %201 = arith.maximumf %199, %200 : vector<8x128xf32>
    %202 = vector.broadcast %75 : f32 to vector<8x128xf32>
    %203 = arith.mulf %202, %201 : vector<8x128xf32>
    %204 = arith.addf %195, %203 : vector<8x128xf32>
    %205 = vector.broadcast %12 : f32 to vector<8x128xf32>
    %206 = arith.mulf %205, %97 : vector<8x128xf32>
    %207 = vector.broadcast %44 : f32 to vector<8x128xf32>
    %208 = arith.addf %206, %207 : vector<8x128xf32>
    %cst_13 = arith.constant 0.000000e+00 : f32
    %209 = vector.broadcast %cst_13 : f32 to vector<8x128xf32>
    %210 = arith.maximumf %208, %209 : vector<8x128xf32>
    %211 = vector.broadcast %76 : f32 to vector<8x128xf32>
    %212 = arith.mulf %211, %210 : vector<8x128xf32>
    %213 = arith.addf %204, %212 : vector<8x128xf32>
    %214 = vector.broadcast %13 : f32 to vector<8x128xf32>
    %215 = arith.mulf %214, %97 : vector<8x128xf32>
    %216 = vector.broadcast %45 : f32 to vector<8x128xf32>
    %217 = arith.addf %215, %216 : vector<8x128xf32>
    %cst_14 = arith.constant 0.000000e+00 : f32
    %218 = vector.broadcast %cst_14 : f32 to vector<8x128xf32>
    %219 = arith.maximumf %217, %218 : vector<8x128xf32>
    %220 = vector.broadcast %77 : f32 to vector<8x128xf32>
    %221 = arith.mulf %220, %219 : vector<8x128xf32>
    %222 = arith.addf %213, %221 : vector<8x128xf32>
    %223 = vector.broadcast %14 : f32 to vector<8x128xf32>
    %224 = arith.mulf %223, %97 : vector<8x128xf32>
    %225 = vector.broadcast %46 : f32 to vector<8x128xf32>
    %226 = arith.addf %224, %225 : vector<8x128xf32>
    %cst_15 = arith.constant 0.000000e+00 : f32
    %227 = vector.broadcast %cst_15 : f32 to vector<8x128xf32>
    %228 = arith.maximumf %226, %227 : vector<8x128xf32>
    %229 = vector.broadcast %78 : f32 to vector<8x128xf32>
    %230 = arith.mulf %229, %228 : vector<8x128xf32>
    %231 = arith.addf %222, %230 : vector<8x128xf32>
    %232 = vector.broadcast %15 : f32 to vector<8x128xf32>
    %233 = arith.mulf %232, %97 : vector<8x128xf32>
    %234 = vector.broadcast %47 : f32 to vector<8x128xf32>
    %235 = arith.addf %233, %234 : vector<8x128xf32>
    %cst_16 = arith.constant 0.000000e+00 : f32
    %236 = vector.broadcast %cst_16 : f32 to vector<8x128xf32>
    %237 = arith.maximumf %235, %236 : vector<8x128xf32>
    %238 = vector.broadcast %79 : f32 to vector<8x128xf32>
    %239 = arith.mulf %238, %237 : vector<8x128xf32>
    %240 = arith.addf %231, %239 : vector<8x128xf32>
    %241 = vector.broadcast %16 : f32 to vector<8x128xf32>
    %242 = arith.mulf %241, %97 : vector<8x128xf32>
    %243 = vector.broadcast %48 : f32 to vector<8x128xf32>
    %244 = arith.addf %242, %243 : vector<8x128xf32>
    %cst_17 = arith.constant 0.000000e+00 : f32
    %245 = vector.broadcast %cst_17 : f32 to vector<8x128xf32>
    %246 = arith.maximumf %244, %245 : vector<8x128xf32>
    %247 = vector.broadcast %80 : f32 to vector<8x128xf32>
    %248 = arith.mulf %247, %246 : vector<8x128xf32>
    %249 = arith.addf %240, %248 : vector<8x128xf32>
    %250 = vector.broadcast %17 : f32 to vector<8x128xf32>
    %251 = arith.mulf %250, %97 : vector<8x128xf32>
    %252 = vector.broadcast %49 : f32 to vector<8x128xf32>
    %253 = arith.addf %251, %252 : vector<8x128xf32>
    %cst_18 = arith.constant 0.000000e+00 : f32
    %254 = vector.broadcast %cst_18 : f32 to vector<8x128xf32>
    %255 = arith.maximumf %253, %254 : vector<8x128xf32>
    %256 = vector.broadcast %81 : f32 to vector<8x128xf32>
    %257 = arith.mulf %256, %255 : vector<8x128xf32>
    %258 = arith.addf %249, %257 : vector<8x128xf32>
    %259 = vector.broadcast %18 : f32 to vector<8x128xf32>
    %260 = arith.mulf %259, %97 : vector<8x128xf32>
    %261 = vector.broadcast %50 : f32 to vector<8x128xf32>
    %262 = arith.addf %260, %261 : vector<8x128xf32>
    %cst_19 = arith.constant 0.000000e+00 : f32
    %263 = vector.broadcast %cst_19 : f32 to vector<8x128xf32>
    %264 = arith.maximumf %262, %263 : vector<8x128xf32>
    %265 = vector.broadcast %82 : f32 to vector<8x128xf32>
    %266 = arith.mulf %265, %264 : vector<8x128xf32>
    %267 = arith.addf %258, %266 : vector<8x128xf32>
    %268 = vector.broadcast %19 : f32 to vector<8x128xf32>
    %269 = arith.mulf %268, %97 : vector<8x128xf32>
    %270 = vector.broadcast %51 : f32 to vector<8x128xf32>
    %271 = arith.addf %269, %270 : vector<8x128xf32>
    %cst_20 = arith.constant 0.000000e+00 : f32
    %272 = vector.broadcast %cst_20 : f32 to vector<8x128xf32>
    %273 = arith.maximumf %271, %272 : vector<8x128xf32>
    %274 = vector.broadcast %83 : f32 to vector<8x128xf32>
    %275 = arith.mulf %274, %273 : vector<8x128xf32>
    %276 = arith.addf %267, %275 : vector<8x128xf32>
    %277 = vector.broadcast %20 : f32 to vector<8x128xf32>
    %278 = arith.mulf %277, %97 : vector<8x128xf32>
    %279 = vector.broadcast %52 : f32 to vector<8x128xf32>
    %280 = arith.addf %278, %279 : vector<8x128xf32>
    %cst_21 = arith.constant 0.000000e+00 : f32
    %281 = vector.broadcast %cst_21 : f32 to vector<8x128xf32>
    %282 = arith.maximumf %280, %281 : vector<8x128xf32>
    %283 = vector.broadcast %84 : f32 to vector<8x128xf32>
    %284 = arith.mulf %283, %282 : vector<8x128xf32>
    %285 = arith.addf %276, %284 : vector<8x128xf32>
    %286 = vector.broadcast %21 : f32 to vector<8x128xf32>
    %287 = arith.mulf %286, %97 : vector<8x128xf32>
    %288 = vector.broadcast %53 : f32 to vector<8x128xf32>
    %289 = arith.addf %287, %288 : vector<8x128xf32>
    %cst_22 = arith.constant 0.000000e+00 : f32
    %290 = vector.broadcast %cst_22 : f32 to vector<8x128xf32>
    %291 = arith.maximumf %289, %290 : vector<8x128xf32>
    %292 = vector.broadcast %85 : f32 to vector<8x128xf32>
    %293 = arith.mulf %292, %291 : vector<8x128xf32>
    %294 = arith.addf %285, %293 : vector<8x128xf32>
    %295 = vector.broadcast %22 : f32 to vector<8x128xf32>
    %296 = arith.mulf %295, %97 : vector<8x128xf32>
    %297 = vector.broadcast %54 : f32 to vector<8x128xf32>
    %298 = arith.addf %296, %297 : vector<8x128xf32>
    %cst_23 = arith.constant 0.000000e+00 : f32
    %299 = vector.broadcast %cst_23 : f32 to vector<8x128xf32>
    %300 = arith.maximumf %298, %299 : vector<8x128xf32>
    %301 = vector.broadcast %86 : f32 to vector<8x128xf32>
    %302 = arith.mulf %301, %300 : vector<8x128xf32>
    %303 = arith.addf %294, %302 : vector<8x128xf32>
    %304 = vector.broadcast %23 : f32 to vector<8x128xf32>
    %305 = arith.mulf %304, %97 : vector<8x128xf32>
    %306 = vector.broadcast %55 : f32 to vector<8x128xf32>
    %307 = arith.addf %305, %306 : vector<8x128xf32>
    %cst_24 = arith.constant 0.000000e+00 : f32
    %308 = vector.broadcast %cst_24 : f32 to vector<8x128xf32>
    %309 = arith.maximumf %307, %308 : vector<8x128xf32>
    %310 = vector.broadcast %87 : f32 to vector<8x128xf32>
    %311 = arith.mulf %310, %309 : vector<8x128xf32>
    %312 = arith.addf %303, %311 : vector<8x128xf32>
    %313 = vector.broadcast %24 : f32 to vector<8x128xf32>
    %314 = arith.mulf %313, %97 : vector<8x128xf32>
    %315 = vector.broadcast %56 : f32 to vector<8x128xf32>
    %316 = arith.addf %314, %315 : vector<8x128xf32>
    %cst_25 = arith.constant 0.000000e+00 : f32
    %317 = vector.broadcast %cst_25 : f32 to vector<8x128xf32>
    %318 = arith.maximumf %316, %317 : vector<8x128xf32>
    %319 = vector.broadcast %88 : f32 to vector<8x128xf32>
    %320 = arith.mulf %319, %318 : vector<8x128xf32>
    %321 = arith.addf %312, %320 : vector<8x128xf32>
    %322 = vector.broadcast %25 : f32 to vector<8x128xf32>
    %323 = arith.mulf %322, %97 : vector<8x128xf32>
    %324 = vector.broadcast %57 : f32 to vector<8x128xf32>
    %325 = arith.addf %323, %324 : vector<8x128xf32>
    %cst_26 = arith.constant 0.000000e+00 : f32
    %326 = vector.broadcast %cst_26 : f32 to vector<8x128xf32>
    %327 = arith.maximumf %325, %326 : vector<8x128xf32>
    %328 = vector.broadcast %89 : f32 to vector<8x128xf32>
    %329 = arith.mulf %328, %327 : vector<8x128xf32>
    %330 = arith.addf %321, %329 : vector<8x128xf32>
    %331 = vector.broadcast %26 : f32 to vector<8x128xf32>
    %332 = arith.mulf %331, %97 : vector<8x128xf32>
    %333 = vector.broadcast %58 : f32 to vector<8x128xf32>
    %334 = arith.addf %332, %333 : vector<8x128xf32>
    %cst_27 = arith.constant 0.000000e+00 : f32
    %335 = vector.broadcast %cst_27 : f32 to vector<8x128xf32>
    %336 = arith.maximumf %334, %335 : vector<8x128xf32>
    %337 = vector.broadcast %90 : f32 to vector<8x128xf32>
    %338 = arith.mulf %337, %336 : vector<8x128xf32>
    %339 = arith.addf %330, %338 : vector<8x128xf32>
    %340 = vector.broadcast %27 : f32 to vector<8x128xf32>
    %341 = arith.mulf %340, %97 : vector<8x128xf32>
    %342 = vector.broadcast %59 : f32 to vector<8x128xf32>
    %343 = arith.addf %341, %342 : vector<8x128xf32>
    %cst_28 = arith.constant 0.000000e+00 : f32
    %344 = vector.broadcast %cst_28 : f32 to vector<8x128xf32>
    %345 = arith.maximumf %343, %344 : vector<8x128xf32>
    %346 = vector.broadcast %91 : f32 to vector<8x128xf32>
    %347 = arith.mulf %346, %345 : vector<8x128xf32>
    %348 = arith.addf %339, %347 : vector<8x128xf32>
    %349 = vector.broadcast %28 : f32 to vector<8x128xf32>
    %350 = arith.mulf %349, %97 : vector<8x128xf32>
    %351 = vector.broadcast %60 : f32 to vector<8x128xf32>
    %352 = arith.addf %350, %351 : vector<8x128xf32>
    %cst_29 = arith.constant 0.000000e+00 : f32
    %353 = vector.broadcast %cst_29 : f32 to vector<8x128xf32>
    %354 = arith.maximumf %352, %353 : vector<8x128xf32>
    %355 = vector.broadcast %92 : f32 to vector<8x128xf32>
    %356 = arith.mulf %355, %354 : vector<8x128xf32>
    %357 = arith.addf %348, %356 : vector<8x128xf32>
    %358 = vector.broadcast %29 : f32 to vector<8x128xf32>
    %359 = arith.mulf %358, %97 : vector<8x128xf32>
    %360 = vector.broadcast %61 : f32 to vector<8x128xf32>
    %361 = arith.addf %359, %360 : vector<8x128xf32>
    %cst_30 = arith.constant 0.000000e+00 : f32
    %362 = vector.broadcast %cst_30 : f32 to vector<8x128xf32>
    %363 = arith.maximumf %361, %362 : vector<8x128xf32>
    %364 = vector.broadcast %93 : f32 to vector<8x128xf32>
    %365 = arith.mulf %364, %363 : vector<8x128xf32>
    %366 = arith.addf %357, %365 : vector<8x128xf32>
    %367 = vector.broadcast %30 : f32 to vector<8x128xf32>
    %368 = arith.mulf %367, %97 : vector<8x128xf32>
    %369 = vector.broadcast %62 : f32 to vector<8x128xf32>
    %370 = arith.addf %368, %369 : vector<8x128xf32>
    %cst_31 = arith.constant 0.000000e+00 : f32
    %371 = vector.broadcast %cst_31 : f32 to vector<8x128xf32>
    %372 = arith.maximumf %370, %371 : vector<8x128xf32>
    %373 = vector.broadcast %94 : f32 to vector<8x128xf32>
    %374 = arith.mulf %373, %372 : vector<8x128xf32>
    %375 = arith.addf %366, %374 : vector<8x128xf32>
    %376 = vector.broadcast %31 : f32 to vector<8x128xf32>
    %377 = arith.mulf %376, %97 : vector<8x128xf32>
    %378 = vector.broadcast %63 : f32 to vector<8x128xf32>
    %379 = arith.addf %377, %378 : vector<8x128xf32>
    %cst_32 = arith.constant 0.000000e+00 : f32
    %380 = vector.broadcast %cst_32 : f32 to vector<8x128xf32>
    %381 = arith.maximumf %379, %380 : vector<8x128xf32>
    %382 = vector.broadcast %95 : f32 to vector<8x128xf32>
    %383 = arith.mulf %382, %381 : vector<8x128xf32>
    %384 = arith.addf %375, %383 : vector<8x128xf32>
    %385 = vector.broadcast %96 : f32 to vector<8x128xf32>
    %386 = arith.addf %384, %385 : vector<8x128xf32>
    %c0_33 = arith.constant 0 : index
    %c0_34 = arith.constant 0 : index
    %387 = vector.load %arg3[%c0_33, %c0_34] : memref<8x128xf32, #tpu.memory_space<vmem>>, vector<8x128xf32>
    tpu.vector_store %arg3[%c0_33, %c0_34], %386 {strides = array<i32>} : memref<8x128xf32, #tpu.memory_space<vmem>>, vector<8x128xf32>,
    return
  }
  func.func @transform_0(%arg0: i32) -> i32 {
    %c0_i32 = arith.constant 0 : i32
    %c0_i32_0 = arith.constant 0 : i32
    return %c0_i32 : i32
  }
  func.func @transform_1(%arg0: i32) -> (i32, i32) {
    %c0_i32 = arith.constant 0 : i32
    %c0_i32_0 = arith.constant 0 : i32
    return %arg0, %c0_i32 : i32, i32
  }
  func.func @transform_2(%arg0: i32) -> (i32, i32) {
    %c0_i32 = arith.constant 0 : i32
    %c0_i32_0 = arith.constant 0 : i32
    return %arg0, %c0_i32 : i32, i32
  }
}

</mosaic_0001>

<bundles_post_ra>
// kernel: tpu_custom_call.1
= control target key start
LH: loop header
LB: loop body
LE: loop exit
PB: predicated region body
PF: predicated region fallthrough
CT: control target
= control target key end

     0   :  { %7 = vsyncpa [#allocation5], 0  ;;  %s927_s0 = inlined_call_operand.hbm [shape: f32[97], index: 0, kind: input, shape index: {}]   ;;  %s928_s1 = inlined_call_operand.hbm [shape: f32[8,128], index: 1, kind: input, shape index: {}]   ;;  %s929_s2 = inlined_call_operand.hbm [shape: f32[8,128], index: 2, kind: output, shape index: {}]  }
   0x1   :  { %8 = vsyncpa [#allocation3], 0 }
   0x2   :  { %9 = vsyncpa [#allocation4], 0  ;;  %s506_s11 = scalar_lea.hbm %s927_s0, 16 }
   0x3   :  { %p507_p0 = scmp.ne.s32.totalorder %s927_s0, %s506_s11  ;;  %p510_p1 = scmp.lt.u32.totalorder %s506_s11, %s927_s0 }
   0x5   :  { %p512_p2 = pnand %p510_p1, %p507_p0 }
   0x7   :  { %515 = shalt.err (!%p512_p2)
}
   0x8   :  { %s566_s16 = smov [#allocation2]   ;;  %s567_s19 = smov [#allocation6]  }
   0x9   :  { %17 = dma.hbm_to_smem %s927_s0, 16, %s566_s16, [#allocation5]  }
   0xa   :  { %s24_s20 = sshll.u32 %s567_s19, 4  ;;  %s516_s23 = scalar_lea.hbm %s928_s1, 128  ;;  %s25_s20 = int_to_ptr.vmem [resolvable:$true] %s24_s20 }
   0xb   :  { %p517_p3 = scmp.ne.s32.totalorder %s928_s1, %s516_s23  ;;  %p520_p4 = scmp.lt.u32.totalorder %s516_s23, %s928_s1 }
   0xd   :  { %p522_p5 = pnand %p520_p4, %p517_p3 }
   0xf   :  { %525 = shalt.err (!%p522_p5)
}
  0x10   :  { %s526_s28 = scalar_lea.vmem %s25_s20, 128  ;;  %p531_p7 = scmp.lt.s32.totalorder %s25_s20, %s25_s20 }
  0x11   :  { %p527_p6 = scmp.ne.s32.totalorder %s25_s20, %s526_s28  ;;  %p532_p8 = scmp.lt.s32.totalorder %s526_s28, %s526_s28 }
  0x13   :  { %p533_p9 = por %p532_p8, %p531_p7 }
  0x15   :  { %p534_p10 = pnand %p533_p9, %p527_p6 }
  0x17   :  { %537 = shalt.err (!%p534_p10)
}
  0x18   :  { %27 = dma.hbm_to_vmem [thread:$0]  %s928_s1, 128, %s25_s20, [#allocation3]  }
  0x19   :  { %560 = dma.done.wait [#allocation5], 16  }
  0x1a   :  { %561 = vsyncadd [#allocation5], 4294967280 }
  0x1b   :  { %562 = dma.done.wait [#allocation3], 128  }
  0x1c   :  { %563 = vsyncadd [#allocation3], 4294967168 }
  0x1d   :  { %34 = sfence }
  0x1e   :  { %s35_s30 = sld [smem:[#allocation2]]  ;;  %s407_s3 = sld [smem:[#allocation2 + $0x1]]  ;;  %v626_v0 = vld [vmem:[#allocation6] sm:$0xff] }
  0x1f   :  { %s408_s4 = sld [smem:[#allocation2 + $0x2]]  ;;  %s409_s5 = sld [smem:[#allocation2 + $0x3]] }
  0x20   :  { %s608_s6 = sld [smem:[#allocation2 + $0x4]]  ;;  %s610_s7 = sld [smem:[#allocation2 + $0x20]] }
  0x21   :  { %s612_s8 = sld [smem:[#allocation2 + $0x21]]  ;;  %s614_s9 = sld [smem:[#allocation2 + $0x5]] }
  0x22   :  { %s616_s10 = sld [smem:[#allocation2 + $0x22]]  ;;  %s618_s1 = sld [smem:[#allocation2 + $0x23]] }
  0x23   :  { %s620_s11 = sld [smem:[#allocation2 + $0x6]]  ;;  %s622_s12 = sld [smem:[#allocation2 + $0x24]] }
  0x24   :  { %s624_s13 = sld [smem:[#allocation2 + $0x7]]  ;;  %v133_v1 = vstv %s35_s30  ;;  %v140_v2 = vstv %s407_s3  ;;  %s628_s14 = sld [smem:[#allocation2 + $0x8]] }
  0x25   :  { %s630_s15 = sld [smem:[#allocation2 + $0x9]]  ;;  %v148_v3 = vstv %s408_s4  ;;  %s632_s16 = sld [smem:[#allocation2 + $0x25]]  ;;  %v156_v4 = vstv %s409_s5  ;;  %v134_v5 = vmul.f32 %v133_v1, %v626_v0  ;;  %v141_v6 = vmul.f32 %v140_v2, %v626_v0 }
  0x26   :  { %s634_s17 = sld [smem:[#allocation2 + $0x26]]  ;;  %v164_v7 = vstv %s608_s6  ;;  %v135_v8 = vstv %s610_s7  ;;  %v149_v10 = vmul.f32 %v148_v3, %v626_v0  ;;  %s642_s18 = sld [smem:[#allocation2 + $0xa]]  ;;  %v157_v12 = vmul.f32 %v156_v4, %v626_v0 }
  0x27   :  { %v142_v9 = vstv %s612_s8  ;;  %s644_s19 = sld [smem:[#allocation2 + $0x27]]  ;;  %v172_v13 = vstv %s614_s9  ;;  %s649_s20 = sld [smem:[#allocation2 + $0xb]]  ;;  %v165_v15 = vmul.f32 %v164_v7, %v626_v0  ;;  %v136_v16 = vadd.f32 %v135_v8, %v134_v5 }
  0x28   :  { %v150_v11 = vstv %s616_s10  ;;  %s651_s21 = sld [smem:[#allocation2 + $0xc]]  ;;  %v158_v14 = vstv %s618_s1  ;;  %s655_s22 = sld [smem:[#allocation2 + $0x28]]  ;;  %v143_v17 = vadd.f32 %v142_v9, %v141_v6  ;;  %v173_v21 = vmul.f32 %v172_v13, %v626_v0 }
  0x29   :  { %s657_s23 = sld [smem:[#allocation2 + $0x29]]  ;;  %v166_v18 = vstv %s622_s12  ;;  %v180_v19 = vstv %s620_s11  ;;  %s661_s24 = sld [smem:[#allocation2 + $0x40]]  ;;  %v151_v20 = vadd.f32 %v150_v11, %v149_v10  ;;  %v159_v22 = vadd.f32 %v158_v14, %v157_v12 }
  0x2a   :  { %s663_s25 = sld [smem:[#allocation2 + $0x41]]  ;;  %s666_s26 = sld [smem:[#allocation2 + $0x42]]  ;;  %v188_v23 = vstv %s624_s13  ;;  %v196_v24 = vstv %s628_s14  ;;  %v167_v26 = vadd.f32 %v166_v18, %v165_v15  ;;  %v181_v28 = vmul.f32 %v180_v19, %v626_v0 }
  0x2b   :  { %s668_s27 = sld [smem:[#allocation2 + $0x43]]  ;;  %v204_v25 = vstv %s630_s15  ;;  %s673_s28 = sld [smem:[#allocation2 + $0x44]]  ;;  %v174_v27 = vstv %s632_s16  ;;  %v137_v29 = vmax.f32 %v136_v16, 0.0  ;;  %v144_v30 = vmax.f32 %v143_v17, 0.0 }
  0x2c   :  { %s675_s0 = sld [smem:[#allocation2 + $0x45]]  ;;  %v182_v31 = vstv %s634_s17  ;;  %s682_s30 = sld [smem:[#allocation2 + $0x2a]]  ;;  %v152_v32 = vmax.f32 %v151_v20, 0.0  ;;  %v189_v33 = vmul.f32 %v188_v23, %v626_v0  ;;  %v197_v34 = vmul.f32 %v196_v24, %v626_v0 }
  0x2d   :  { %s679_s29 = sld [smem:[#allocation2 + $0xd]]  ;;  %s684_s3 = sld [smem:[#allocation2 + $0x46]]  ;;  %v205_v35 = vmul.f32 %v204_v25, %v626_v0  ;;  %v160_v36 = vmax.f32 %v159_v22, 0.0  ;;  %v175_v37 = vadd.f32 %v174_v27, %v173_v21  ;;  %v190_v38 = vstv %s644_s19 }
  0x2e   :  { %s689_s4 = sld [smem:[#allocation2 + $0xe]]  ;;  %v212_v39 = vstv %s642_s18  ;;  %s693_s5 = sld [smem:[#allocation2 + $0x2b]]  ;;  %v168_v42 = vmax.f32 %v167_v26, 0.0  ;;  %v183_v43 = vadd.f32 %v182_v31, %v181_v28  ;;  %v198_v50 = vstv %s655_s22 }
  0x2f   :  { %s695_s6 = sld [smem:[#allocation2 + $0x47]]  ;;  %v138_v40 = vstv %s661_s24  ;;  %s703_s8 = sld [smem:[#allocation2 + $0x2c]]  ;;  %v220_v51 = vstv %s649_s20  ;;  %v176_v54 = vmax.f32 %v175_v37, 0.0  ;;  %v191_v55 = vadd.f32 %v190_v38, %v189_v33 }
  0x30   :  { %v145_v41 = vstv %s663_s25  ;;  %s699_s7 = sld [smem:[#allocation2 + $0xf]]  ;;  %v139_v44 = vmul.f32 %v138_v40, %v137_v29  ;;  %v153_v46 = vstv %s666_s26  ;;  %s705_s9 = sld [smem:[#allocation2 + $0x48]]  ;;  %v206_v57 = vstv %s657_s23 }
  0x31   :  { %v146_v45 = vmul.f32 %v145_v41, %v144_v30  ;;  %v161_v47 = vstv %s668_s27  ;;  %v154_v48 = vmul.f32 %v153_v46, %v152_v32  ;;  %v169_v49 = vstv %s673_s28  ;;  %s710_s10 = sld [smem:[#allocation2 + $0x10]]  ;;  %s712_s1 = sld [smem:[#allocation2 + $0x2d]] }
  0x32   :  { %v162_v53 = vmul.f32 %v161_v47, %v160_v36  ;;  %s714_s11 = sld [smem:[#allocation2 + $0x49]]  ;;  %v177_v56 = vstv %s675_s0  ;;  %v213_v58 = vmul.f32 %v212_v39, %v626_v0  ;;  %v228_v59 = vstv %s651_s21  ;;  %s722_s13 = sld [smem:[#allocation2 + $0x2e]] }
  0x33   :  { %v147_v52 = vadd.f32 %v146_v45, %v139_v44  ;;  %s720_s12 = sld [smem:[#allocation2 + $0x11]]  ;;  %v170_v61 = vmul.f32 %v169_v49, %v168_v42  ;;  %v184_v62 = vmax.f32 %v183_v43, 0.0  ;;  %v199_v63 = vadd.f32 %v198_v50, %v197_v34  ;;  %s724_s14 = sld [smem:[#allocation2 + $0x4a]] }
  0x34   :  { %v185_v1 = vstv %s684_s3  ;;  %v214_v2 = vstv %s682_s30  ;;  %v221_v3 = vmul.f32 %v220_v51, %v626_v0  ;;  %v236_v4 = vstv %s679_s29  ;;  %s730_s15 = sld [smem:[#allocation2 + $0x12]]  ;;  %s732_s16 = sld [smem:[#allocation2 + $0x2f]] }
  0x35   :  { %v155_v60 = vadd.f32 %v154_v48, %v147_v52  ;;  %v178_v6 = vmul.f32 %v177_v56, %v176_v54  ;;  %v192_v7 = vmax.f32 %v191_v55, 0.0  ;;  %v207_v8 = vadd.f32 %v206_v57, %v205_v35  ;;  %s734_s17 = sld [smem:[#allocation2 + $0x4b]]  ;;  %s742_s19 = sld [smem:[#allocation2 + $0x30]] }
  0x36   :  { %v193_v9 = vstv %s695_s6  ;;  %v222_v10 = vstv %s693_s5  ;;  %v229_v11 = vmul.f32 %v228_v59, %v626_v0  ;;  %v244_v12 = vstv %s689_s4  ;;  %s740_s18 = sld [smem:[#allocation2 + $0x13]]  ;;  %s744_s20 = sld [smem:[#allocation2 + $0x4c]] }
  0x37   :  { %v163_v5 = vadd.f32 %v162_v53, %v155_v60  ;;  %v186_v14 = vmul.f32 %v185_v1, %v184_v62  ;;  %v200_v15 = vmax.f32 %v199_v63, 0.0  ;;  %v215_v16 = vadd.f32 %v214_v2, %v213_v58  ;;  %s750_s21 = sld [smem:[#allocation2 + $0x14]]  ;;  %s752_s22 = sld [smem:[#allocation2 + $0x31]] }
  0x38   :  { %v201_v17 = vstv %s705_s9  ;;  %v230_v18 = vstv %s703_s8  ;;  %v237_v19 = vmul.f32 %v236_v4, %v626_v0  ;;  %v252_v20 = vstv %s699_s7  ;;  %s754_s23 = sld [smem:[#allocation2 + $0x4d]]  ;;  %s762_s25 = sld [smem:[#allocation2 + $0x32]] }
  0x39   :  { %v171_v13 = vadd.f32 %v170_v61, %v163_v5  ;;  %v194_v22 = vmul.f32 %v193_v9, %v192_v7  ;;  %v208_v23 = vmax.f32 %v207_v8, 0.0  ;;  %v223_v24 = vadd.f32 %v222_v10, %v221_v3  ;;  %s760_s24 = sld [smem:[#allocation2 + $0x15]]  ;;  %s764_s26 = sld [smem:[#allocation2 + $0x4e]] }
  0x3a   :  { %v209_v25 = vstv %s714_s11  ;;  %v238_v26 = vstv %s712_s1  ;;  %v245_v27 = vmul.f32 %v244_v12, %v626_v0  ;;  %v260_v28 = vstv %s710_s10  ;;  %s770_s27 = sld [smem:[#allocation2 + $0x16]]  ;;  %s772_s28 = sld [smem:[#allocation2 + $0x33]] }
  0x3b   :  { %v179_v21 = vadd.f32 %v178_v6, %v171_v13  ;;  %v202_v30 = vmul.f32 %v201_v17, %v200_v15  ;;  %v216_v31 = vmax.f32 %v215_v16, 0.0  ;;  %v231_v32 = vadd.f32 %v230_v18, %v229_v11  ;;  %s774_s0 = sld [smem:[#allocation2 + $0x4f]]  ;;  %s782_s30 = sld [smem:[#allocation2 + $0x34]] }
  0x3c   :  { %v217_v33 = vstv %s724_s14  ;;  %v246_v34 = vstv %s722_s13  ;;  %v253_v35 = vmul.f32 %v252_v20, %v626_v0  ;;  %v268_v36 = vstv %s720_s12  ;;  %s780_s29 = sld [smem:[#allocation2 + $0x17]]  ;;  %s784_s3 = sld [smem:[#allocation2 + $0x50]] }
  0x3d   :  { %v187_v29 = vadd.f32 %v186_v14, %v179_v21  ;;  %v210_v38 = vmul.f32 %v209_v25, %v208_v23  ;;  %v224_v39 = vmax.f32 %v223_v24, 0.0  ;;  %v239_v40 = vadd.f32 %v238_v26, %v237_v19  ;;  %s790_s4 = sld [smem:[#allocation2 + $0x18]]  ;;  %s792_s5 = sld [smem:[#allocation2 + $0x35]] }
  0x3e   :  { %v225_v41 = vstv %s734_s17  ;;  %v254_v42 = vstv %s732_s16  ;;  %v261_v43 = vmul.f32 %v260_v28, %v626_v0  ;;  %v276_v44 = vstv %s730_s15  ;;  %s794_s6 = sld [smem:[#allocation2 + $0x51]]  ;;  %s802_s8 = sld [smem:[#allocation2 + $0x36]] }
  0x3f   :  { %v195_v37 = vadd.f32 %v194_v22, %v187_v29  ;;  %v218_v46 = vmul.f32 %v217_v33, %v216_v31  ;;  %v232_v47 = vmax.f32 %v231_v32, 0.0  ;;  %v247_v48 = vadd.f32 %v246_v34, %v245_v27  ;;  %s800_s7 = sld [smem:[#allocation2 + $0x19]]  ;;  %s804_s9 = sld [smem:[#allocation2 + $0x52]] }
  0x40   :  { %v233_v49 = vstv %s744_s20  ;;  %v262_v50 = vstv %s742_s19  ;;  %v269_v51 = vmul.f32 %v268_v36, %v626_v0  ;;  %v284_v52 = vstv %s740_s18  ;;  %s810_s10 = sld [smem:[#allocation2 + $0x1a]]  ;;  %s812_s1 = sld [smem:[#allocation2 + $0x37]] }
  0x41   :  { %v203_v45 = vadd.f32 %v202_v30, %v195_v37  ;;  %v226_v54 = vmul.f32 %v225_v41, %v224_v39  ;;  %v240_v55 = vmax.f32 %v239_v40, 0.0  ;;  %v255_v56 = vadd.f32 %v254_v42, %v253_v35  ;;  %s814_s11 = sld [smem:[#allocation2 + $0x53]]  ;;  %s822_s13 = sld [smem:[#allocation2 + $0x38]] }
  0x42   :  { %v241_v57 = vstv %s754_s23  ;;  %v270_v58 = vstv %s752_s22  ;;  %v277_v59 = vmul.f32 %v276_v44, %v626_v0  ;;  %v292_v60 = vstv %s750_s21  ;;  %s820_s12 = sld [smem:[#allocation2 + $0x1b]]  ;;  %s824_s14 = sld [smem:[#allocation2 + $0x54]] }
  0x43   :  { %v211_v53 = vadd.f32 %v210_v38, %v203_v45  ;;  %v234_v62 = vmul.f32 %v233_v49, %v232_v47  ;;  %v248_v63 = vmax.f32 %v247_v48, 0.0  ;;  %v263_v1 = vadd.f32 %v262_v50, %v261_v43  ;;  %s830_s15 = sld [smem:[#allocation2 + $0x1c]]  ;;  %s832_s16 = sld [smem:[#allocation2 + $0x39]] }
  0x44   :  { %v249_v2 = vstv %s764_s26  ;;  %v278_v3 = vstv %s762_s25  ;;  %v285_v4 = vmul.f32 %v284_v52, %v626_v0  ;;  %v300_v5 = vstv %s760_s24  ;;  %s834_s17 = sld [smem:[#allocation2 + $0x55]]  ;;  %s842_s19 = sld [smem:[#allocation2 + $0x3a]] }
  0x45   :  { %v219_v61 = vadd.f32 %v218_v46, %v211_v53  ;;  %v242_v7 = vmul.f32 %v241_v57, %v240_v55  ;;  %v256_v8 = vmax.f32 %v255_v56, 0.0  ;;  %v271_v9 = vadd.f32 %v270_v58, %v269_v51  ;;  %s840_s18 = sld [smem:[#allocation2 + $0x1d]]  ;;  %s844_s20 = sld [smem:[#allocation2 + $0x56]] }
  0x46   :  { %v257_v10 = vstv %s774_s0  ;;  %v286_v11 = vstv %s772_s28  ;;  %v293_v12 = vmul.f32 %v292_v60, %v626_v0  ;;  %v308_v13 = vstv %s770_s27  ;;  %s850_s21 = sld [smem:[#allocation2 + $0x1e]]  ;;  %s852_s22 = sld [smem:[#allocation2 + $0x3b]] }
  0x47   :  { %v227_v6 = vadd.f32 %v226_v54, %v219_v61  ;;  %v250_v15 = vmul.f32 %v249_v2, %v248_v63  ;;  %v264_v16 = vmax.f32 %v263_v1, 0.0  ;;  %v279_v17 = vadd.f32 %v278_v3, %v277_v59  ;;  %s854_s23 = sld [smem:[#allocation2 + $0x57]]  ;;  %s862_s25 = sld [smem:[#allocation2 + $0x3c]] }
  0x48   :  { %v265_v18 = vstv %s784_s3  ;;  %v294_v19 = vstv %s782_s30  ;;  %v301_v20 = vmul.f32 %v300_v5, %v626_v0  ;;  %v316_v21 = vstv %s780_s29  ;;  %s860_s24 = sld [smem:[#allocation2 + $0x1f]]  ;;  %s864_s26 = sld [smem:[#allocation2 + $0x58]] }
  0x49   :  { %v235_v14 = vadd.f32 %v234_v62, %v227_v6  ;;  %v258_v23 = vmul.f32 %v257_v10, %v256_v8  ;;  %v272_v24 = vmax.f32 %v271_v9, 0.0  ;;  %v287_v25 = vadd.f32 %v286_v11, %v285_v4  ;;  %s870_s27 = sld [smem:[#allocation2 + $0x3d]]  ;;  %s872_s28 = sld [smem:[#allocation2 + $0x59]] }
  0x4a   :  { %v273_v26 = vstv %s794_s6  ;;  %v302_v27 = vstv %s792_s5  ;;  %v309_v28 = vmul.f32 %v308_v13, %v626_v0  ;;  %v324_v29 = vstv %s790_s4  ;;  %s878_s0 = sld [smem:[#allocation2 + $0x3e]]  ;;  %s880_s29 = sld [smem:[#allocation2 + $0x5a]] }
  0x4b   :  { %v243_v22 = vadd.f32 %v242_v7, %v235_v14  ;;  %v266_v31 = vmul.f32 %v265_v18, %v264_v16  ;;  %v280_v32 = vmax.f32 %v279_v17, 0.0  ;;  %v295_v33 = vadd.f32 %v294_v19, %v293_v12  ;;  %s886_s30 = sld [smem:[#allocation2 + $0x3f]]  ;;  %s888_s3 = sld [smem:[#allocation2 + $0x5b]] }
  0x4c   :  { %v281_v34 = vstv %s804_s9  ;;  %v310_v35 = vstv %s802_s8  ;;  %v317_v36 = vmul.f32 %v316_v21, %v626_v0  ;;  %v332_v37 = vstv %s800_s7  ;;  %s894_s4 = sld [smem:[#allocation2 + $0x5c]]  ;;  %s900_s5 = sld [smem:[#allocation2 + $0x5d]] }
  0x4d   :  { %v251_v30 = vadd.f32 %v250_v15, %v243_v22  ;;  %v274_v39 = vmul.f32 %v273_v26, %v272_v24  ;;  %v288_v40 = vmax.f32 %v287_v25, 0.0  ;;  %v303_v41 = vadd.f32 %v302_v27, %v301_v20  ;;  %s905_s6 = sld [smem:[#allocation2 + $0x5e]]  ;;  %s501_s7 = sld [smem:[#allocation2 + $0x5f]] }
  0x4e   :  { %v289_v42 = vstv %s814_s11  ;;  %v318_v43 = vstv %s812_s1  ;;  %v325_v44 = vmul.f32 %v324_v29, %v626_v0  ;;  %v340_v45 = vstv %s810_s10  ;;  %s502_s8 = sld [smem:[#allocation2 + $0x60]]  ;;  %s568_s9 = smov [#allocation7]  }
  0x4f   :  { %v259_v38 = vadd.f32 %v258_v23, %v251_v30  ;;  %v282_v47 = vmul.f32 %v281_v34, %v280_v32  ;;  %v296_v48 = vmax.f32 %v295_v33, 0.0  ;;  %v311_v49 = vadd.f32 %v310_v35, %v309_v28  ;;  %s397_s10 = sshll.u32 %s568_s9, 4  ;;  %s398_s10 = int_to_ptr.vmem [resolvable:$true] %s397_s10 }
  0x50   :  { %v297_v50 = vstv %s824_s14  ;;  %v326_v51 = vstv %s822_s13  ;;  %v333_v52 = vmul.f32 %v332_v37, %v626_v0  ;;  %v348_v53 = vstv %s820_s12  ;;  %s538_s1 = scalar_lea.vmem %s398_s10, 128  ;;  %p543_p12 = scmp.lt.s32.totalorder %s398_s10, %s398_s10 }
  0x51   :  { %v267_v46 = vadd.f32 %v266_v31, %v259_v38  ;;  %v290_v55 = vmul.f32 %v289_v42, %v288_v40  ;;  %v304_v56 = vmax.f32 %v303_v41, 0.0  ;;  %v319_v57 = vadd.f32 %v318_v43, %v317_v36  ;;  %p539_p11 = scmp.ne.s32.totalorder %s398_s10, %s538_s1  ;;  %p544_p13 = scmp.lt.s32.totalorder %s538_s1, %s538_s1 }
  0x52   :  { %v305_v58 = vstv %s834_s17  ;;  %v334_v59 = vstv %s832_s16  ;;  %v341_v60 = vmul.f32 %v340_v45, %v626_v0  ;;  %v356_v61 = vstv %s830_s15 }
  0x53   :  { %v275_v54 = vadd.f32 %v274_v39, %v267_v46  ;;  %v298_v63 = vmul.f32 %v297_v50, %v296_v48  ;;  %v312_v1 = vmax.f32 %v311_v49, 0.0  ;;  %v327_v2 = vadd.f32 %v326_v51, %v325_v44  ;;  %p545_p0 = por %p544_p13, %p543_p12 }
  0x54   :  { %v313_v3 = vstv %s844_s20  ;;  %v342_v4 = vstv %s842_s19  ;;  %v349_v5 = vmul.f32 %v348_v53, %v626_v0  ;;  %v364_v6 = vstv %s840_s18 }
  0x55   :  { %v283_v62 = vadd.f32 %v282_v47, %v275_v54  ;;  %v306_v8 = vmul.f32 %v305_v58, %v304_v56  ;;  %v320_v9 = vmax.f32 %v319_v57, 0.0  ;;  %v335_v10 = vadd.f32 %v334_v59, %v333_v52  ;;  %p546_p1 = pnand %p545_p0, %p539_p11 }
  0x56   :  { %v321_v11 = vstv %s854_s23  ;;  %v350_v12 = vstv %s852_s22  ;;  %v357_v13 = vmul.f32 %v356_v61, %v626_v0  ;;  %v372_v14 = vstv %s850_s21 }
  0x57   :  { %v291_v7 = vadd.f32 %v290_v55, %v283_v62  ;;  %v314_v16 = vmul.f32 %v313_v3, %v312_v1  ;;  %v328_v17 = vmax.f32 %v327_v2, 0.0  ;;  %v343_v18 = vadd.f32 %v342_v4, %v341_v60 }
  0x58   :  { %v329_v19 = vstv %s864_s26  ;;  %v358_v20 = vstv %s862_s25  ;;  %v365_v21 = vmul.f32 %v364_v6, %v626_v0  ;;  %v380_v22 = vstv %s860_s24 }
  0x59   :  { %v299_v15 = vadd.f32 %v298_v63, %v291_v7  ;;  %v322_v24 = vmul.f32 %v321_v11, %v320_v9  ;;  %v336_v25 = vmax.f32 %v335_v10, 0.0  ;;  %v351_v26 = vadd.f32 %v350_v12, %v349_v5 }
  0x5a   :  { %v337_v27 = vstv %s872_s28  ;;  %v366_v28 = vstv %s870_s27  ;;  %v373_v29 = vmul.f32 %v372_v14, %v626_v0  ;;  %v330_v31 = vmul.f32 %v329_v19, %v328_v17 }
  0x5b   :  { %v307_v23 = vadd.f32 %v306_v8, %v299_v15  ;;  %v344_v32 = vmax.f32 %v343_v18, 0.0  ;;  %v359_v33 = vadd.f32 %v358_v20, %v357_v13  ;;  %v345_v34 = vstv %s880_s29 }
  0x5c   :  { %v374_v35 = vstv %s878_s0  ;;  %v381_v36 = vmul.f32 %v380_v22, %v626_v0  ;;  %v338_v38 = vmul.f32 %v337_v27, %v336_v25  ;;  %v352_v39 = vmax.f32 %v351_v26, 0.0 }
  0x5d   :  { %v315_v30 = vadd.f32 %v314_v16, %v307_v23  ;;  %v367_v40 = vadd.f32 %v366_v28, %v365_v21  ;;  %v353_v41 = vstv %s888_s3  ;;  %v382_v42 = vstv %s886_s30 }
  0x5e   :  { %v346_v44 = vmul.f32 %v345_v34, %v344_v32  ;;  %v360_v45 = vmax.f32 %v359_v33, 0.0  ;;  %v375_v46 = vadd.f32 %v374_v35, %v373_v29  ;;  %v361_v47 = vstv %s894_s4 }
  0x5f   :  { %v323_v37 = vadd.f32 %v322_v24, %v315_v30  ;;  %v354_v49 = vmul.f32 %v353_v41, %v352_v39  ;;  %v368_v50 = vmax.f32 %v367_v40, 0.0  ;;  %v383_v51 = vadd.f32 %v382_v42, %v381_v36 }
  0x60   :  { %v369_v52 = vstv %s900_s5  ;;  %v362_v53 = vmul.f32 %v361_v47, %v360_v45  ;;  %v376_v54 = vmax.f32 %v375_v46, 0.0  ;;  %v377_v55 = vstv %s905_s6 }
  0x61   :  { %v331_v43 = vadd.f32 %v330_v31, %v323_v37  ;;  %v370_v57 = vmul.f32 %v369_v52, %v368_v50  ;;  %v384_v58 = vmax.f32 %v383_v51, 0.0  ;;  %v385_v59 = vstv %s501_s7 }
  0x62   :  { %v378_v61 = vmul.f32 %v377_v55, %v376_v54  ;;  %v388_v2 = vstv %s502_s8 }
  0x63   :  { %v339_v48 = vadd.f32 %v338_v38, %v331_v43  ;;  %v386_v63 = vmul.f32 %v385_v59, %v384_v58 }
  0x65   :  { %v347_v0 = vadd.f32 %v346_v44, %v339_v48 }
  0x67   :  { %v355_v56 = vadd.f32 %v354_v49, %v347_v0 }
  0x69   :  { %v363_v60 = vadd.f32 %v362_v53, %v355_v56 }
  0x6b   :  { %v371_v62 = vadd.f32 %v370_v57, %v363_v60 }
  0x6d   :  { %v379_v1 = vadd.f32 %v378_v61, %v371_v62 }
  0x6f   :  { %v387_v3 = vadd.f32 %v386_v63, %v379_v1 }
  0x71   :  { %v389_v4 = vadd.f32 %v388_v2, %v387_v3 }
  0x73   :  { %390 = vst [vmem:[#allocation7] sm:$0xff] %v389_v4 }
  0x74   :  { %549 = shalt.err (!%p546_p1)
}
  0x75   :  { %s550_s13 = scalar_lea.hbm %s929_s2, 128 }
  0x76   :  { %p551_p2 = scmp.ne.s32.totalorder %s929_s2, %s550_s13  ;;  %p554_p3 = scmp.lt.u32.totalorder %s550_s13, %s929_s2 }
  0x78   :  { %p556_p4 = pnand %p554_p3, %p551_p2 }
  0x7a   :  { %559 = shalt.err (!%p556_p4)
}
  0x7b   :  { %400 = dma.vmem_to_hbm [thread:$0]  %s398_s10, 128, %s929_s2, [#allocation4]  }
  0x7c   :  { %564 = dma.done.wait [#allocation4], 128  }
  0x7d   :  { %565 = vsyncadd [#allocation4], 4294967168 }
  0x7e   :  { %404 = vsyncpa [#allocation3], 1 }
  0x7f   :  { %405 = vsyncpa [#allocation4], 1 }
  0x80   :  { %406 = vsyncpa [#allocation5], 1 }

</bundles_post_ra>
